<compile_context>
chip_gen: v6e
topology: v6e:2x2x1
jax: 0.10.0
libtpu: 0.0.40
codegen_flags: <defaults>
</compile_context>

<pallas_src>
import functools

import jax
import jax.numpy as jnp
from jax.experimental import pallas as pl
from jax.experimental.pallas import tpu as pltpu

_VMEM_LIMIT_BYTES = 32 * 1024 * 1024  # worst-case double-buffered blocks ~ 6 MB; safe on v5e/v6e/v7x


# --------------------------------------------------------------------------------------
# Pallas matmul kernel:  C = act(A @ B * scale + shift [+ residual])  (residual may be
# applied before or after the activation).
#   A: (M, K) bf16 patches, B: (K, N) bf16 weights, scale/shift: (1, N) f32.
#   Full-K blocks -> a single MXU matmul per (i, j) output tile, no scratch accumulator.
# --------------------------------------------------------------------------------------
def _mm_kernel(a_ref, b_ref, s_ref, t_ref, *rest, act, has_res, res_after_act):
    if has_res:
        r_ref, o_ref = rest
    else:
        (o_ref,) = rest
    y = jnp.dot(a_ref[...], b_ref[...], preferred_element_type=jnp.float32)
    y = y * s_ref[...] + t_ref[...]
    if has_res and not res_after_act:
        y = y + r_ref[...]
    if act == "relu":
        y = jnp.maximum(y, 0.0)
    elif act == "sigmoid":
        y = jax.nn.sigmoid(y)
    if has_res and res_after_act:
        y = y + r_ref[...]
    o_ref[...] = y.astype(o_ref.dtype)


@functools.lru_cache(maxsize=None)
def _build_matmul(M, K, N, tm, tn, act, has_res, res_after_act):
    grid = (pl.cdiv(M, tm), pl.cdiv(N, tn))
    in_specs = [
        pl.BlockSpec((tm, K), lambda i, j: (i, 0)),   # A: full-K block
        pl.BlockSpec((K, tn), lambda i, j: (0, j)),   # B: full-K block
        pl.BlockSpec((1, tn), lambda i, j: (0, j)),   # scale
        pl.BlockSpec((1, tn), lambda i, j: (0, j)),   # shift
    ]
    if has_res:
        in_specs.append(pl.BlockSpec((tm, tn), lambda i, j: (i, j)))
    kern = functools.partial(_mm_kernel, act=act, has_res=has_res,
                             res_after_act=res_after_act)
    return pl.pallas_call(
        kern,
        out_shape=jax.ShapeDtypeStruct((M, N), jnp.float32),
        grid_spec=pltpu.PrefetchScalarGridSpec(
            num_scalar_prefetch=0,
            grid=grid,
            in_specs=in_specs,
            out_specs=pl.BlockSpec((tm, tn), lambda i, j: (i, j)),
        ),
        compiler_params=pltpu.CompilerParams(
            dimension_semantics=("parallel", "parallel"),
            vmem_limit_bytes=_VMEM_LIMIT_BYTES,
        ),
    )


def matmul_fused(A, B, scale, shift, act="none", residual=None, res_after_act=False):
    """A:(M,K), B:(K,N), scale/shift:(1,N).  Returns f32 (M,N).  Weights are normally
    pre-padded so N % 128 == 0; a fallback pad keeps the kernel lane-dense otherwise."""
    M, K = A.shape
    N = B.shape[1]
    if N % 128 != 0:  # safety net; not hit with pre-padded params
        Np = ((N + 127) // 128) * 128
        B = jnp.pad(B, ((0, 0), (0, Np - N)))
        scale = jnp.pad(scale, ((0, 0), (0, Np - N)), constant_values=1.0)
        shift = jnp.pad(shift, ((0, 0), (0, Np - N)))
        if residual is not None:
            residual = jnp.pad(residual, ((0, 0), (0, Np - N)))
    else:
        Np = N
    tm = 256 if M > 256 else M               # equals full dim when small -> legal block
    tn = 256 if Np % 256 == 0 else 128
    args = [A.astype(jnp.bfloat16), B.astype(jnp.bfloat16),
            scale.astype(jnp.float32), shift.astype(jnp.float32)]
    has_res = residual is not None
    if has_res:
        args.append(residual.astype(jnp.float32))
    out = _build_matmul(M, K, Np, tm, tn, act, has_res, res_after_act)(*args)
    return out if Np == N else out[:, :N]


# --------------------------------------------------------------------------------------
# Pallas elementwise combine kernel (n-ary add or max, optional relu).  Inputs are
# flattened to a lane-dense (rows, L) layout (L a large multiple of 128) for unmasked
# vector stores.
# --------------------------------------------------------------------------------------
def _ew_kernel(*refs, nin, op, act):
    o_ref = refs[nin]
    acc = refs[0][...]
    for r in refs[1:nin]:
        acc = acc + r[...] if op == "add" else jnp.maximum(acc, r[...])
    if act == "relu":
        acc = jnp.maximum(acc, 0.0)
    o_ref[...] = acc


@functools.lru_cache(maxsize=None)
def _build_ew(R, L, tr, nin, op, act):
    kern = functools.partial(_ew_kernel, nin=nin, op=op, act=act)
    spec = pl.BlockSpec((tr, L), lambda i: (i, 0))
    return pl.pallas_call(
        kern,
        out_shape=jax.ShapeDtypeStruct((R, L), jnp.float32),
        grid_spec=pltpu.PrefetchScalarGridSpec(
            num_scalar_prefetch=0,
            grid=(pl.cdiv(R, tr),),
            in_specs=[spec] * nin,
            out_specs=spec,
        ),
        compiler_params=pltpu.CompilerParams(
            dimension_semantics=("parallel",),
            vmem_limit_bytes=_VMEM_LIMIT_BYTES,
        ),
    )


def ew_combine(arrays, op="add", act="none"):
    shape = arrays[0].shape
    T = arrays[0].size
    L = None
    for cand in (2048, 1024, 512, 256, 128):      # prefer wide lanes with >= 8 rows
        if T % cand == 0 and T // cand >= 8:
            L = cand
            break
    if L is None:
        L = 128 if T % 128 == 0 else shape[-1]
    R = T // L
    # bound block footprint: tr*L*4B per operand, double-buffered, up to 10 operands
    tr = min(R, max(8, (131072 // L) // 8 * 8))
    flats = [a.astype(jnp.float32).reshape(R, L) for a in arrays]
    out = _build_ew(R, L, tr, len(arrays), op, act)(*flats)
    return out.reshape(shape)


# --------------------------------------------------------------------------------------
# Conv / transposed-conv / maxpool built on the Pallas kernels (patch extraction = glue)
# --------------------------------------------------------------------------------------
def _extract_patches(x, kh, kw, stride, pad, dilation=1):
    pt, pb, pleft, pright = pad
    xp = jnp.pad(x, ((0, 0), (pt, pb), (pleft, pright), (0, 0)))
    _, Hp, Wp, _ = xp.shape
    eff_h = dilation * (kh - 1) + 1
    eff_w = dilation * (kw - 1) + 1
    Ho = (Hp - eff_h) // stride + 1
    Wo = (Wp - eff_w) // stride + 1
    cols = []
    for i in range(kh):
        for j in range(kw):
            cols.append(
                xp[:, i * dilation: i * dilation + (Ho - 1) * stride + 1: stride,
                      j * dilation: j * dilation + (Wo - 1) * stride + 1: stride, :]
            )
    return jnp.concatenate(cols, axis=-1), Ho, Wo


def conv2d(x, cp, *, stride=1, padding=0, dilation=1, act="none",
           residual=None, res_after_act=False):
    kh, kw, ci, co, cop = cp["kh"], cp["kw"], cp["cin"], cp["cout"], cp["cout_pad"]
    pad = (padding,) * 4 if isinstance(padding, int) else padding
    # build the im2col patches directly in bf16 (half the HBM traffic of f32 im2col)
    patches, Ho, Wo = _extract_patches(x.astype(jnp.bfloat16), kh, kw, stride, pad, dilation)
    Nb = x.shape[0]
    A = patches.reshape(Nb * Ho * Wo, kh * kw * ci)
    res = None
    if residual is not None:
        res = residual.reshape(Nb * Ho * Wo, co)
        if cop != co:
            res = jnp.pad(res, ((0, 0), (0, cop - co)))
    out = matmul_fused(A, cp["B"], cp["scale"], cp["shift"], act=act,
                       residual=res, res_after_act=res_after_act)
    if cop != co:
        out = out[:, :co]
    return out.reshape(Nb, Ho, Wo, co)


def _zero_insert(x, s):
    if s == 1:
        return x
    N, H, W, C = x.shape
    y = jnp.zeros((N, (H - 1) * s + 1, (W - 1) * s + 1, C), x.dtype)
    return y.at[:, ::s, ::s, :].set(x)


def conv_transpose2d(x, cp, *, stride, padding, output_padding=0, act="none"):
    kh, kw = cp["kh"], cp["kw"]
    xz = _zero_insert(x, stride)
    pt = kh - 1 - padding
    pb = kh - 1 - padding + output_padding
    pleft = kw - 1 - padding
    pright = kw - 1 - padding + output_padding
    return conv2d(xz, cp, stride=1, padding=(pt, pb, pleft, pright), act=act)


def maxpool_3x3_s2_p1(x):
    N, H, W, C = x.shape
    xp = jnp.pad(x, ((0, 0), (1, 1), (1, 1), (0, 0)), constant_values=-1e30)
    Ho = (H + 2 - 3) // 2 + 1
    Wo = (W + 2 - 3) // 2 + 1
    views = []
    for i in range(3):
        for j in range(3):
            views.append(xp[:, i: i + 2 * (Ho - 1) + 1: 2, j: j + 2 * (Wo - 1) + 1: 2, :])
    return ew_combine(views, op="max")


# --------------------------------------------------------------------------------------
# Deterministic parameter construction (weights pre-reshaped to (K, O) bf16 and padded
# to O % 128 == 0; eval-mode BatchNorm / bias pre-folded into per-channel scale+shift)
# --------------------------------------------------------------------------------------
class PRNG:
    def __init__(self, seed):
        self.key = jax.random.PRNGKey(seed)

    def next(self):
        self.key, sub = jax.random.split(self.key)
        return sub


def _bn_synth(c):
    # (gamma, beta, running_mean, running_var, eps) -- eval-mode BatchNorm
    return (jnp.ones((c,), jnp.float32), jnp.zeros((c,), jnp.float32),
            jnp.zeros((c,), jnp.float32), jnp.ones((c,), jnp.float32), 1e-5)


def _fold_bn(cout, bn, bias):
    if bn is not None:
        gamma, beta, mean, var, eps = bn
        scale = gamma / jnp.sqrt(var + eps)
        shift = beta - mean * scale
        if bias is not None:
            shift = shift + scale * bias
    else:
        scale = jnp.ones((cout,), jnp.float32)
        shift = bias if bias is not None else jnp.zeros((cout,), jnp.float32)
    return (scale.reshape(1, -1).astype(jnp.float32),
            shift.reshape(1, -1).astype(jnp.float32))


def _fuse(w_oihw, bn, bias):
    o, i, kh, kw = w_oihw.shape
    Bm = jnp.transpose(w_oihw, (2, 3, 1, 0)).reshape(kh * kw * i, o).astype(jnp.bfloat16)
    s, t = _fold_bn(o, bn, bias)
    o_pad = ((o + 127) // 128) * 128
    if o_pad != o:   # pre-pad once so every Pallas store is a full 128-lane tile
        Bm = jnp.pad(Bm, ((0, 0), (0, o_pad - o)))
        s = jnp.pad(s, ((0, 0), (0, o_pad - o)), constant_values=1.0)
        t = jnp.pad(t, ((0, 0), (0, o_pad - o)))
    return {"B": Bm, "scale": s, "shift": t, "kh": kh, "kw": kw,
            "cin": i, "cout": o, "cout_pad": o_pad}


def make_conv(rng, o, i, kh, kw, *, bn=True, bias=False):
    std = (2.0 / (o * kh * kw)) ** 0.5  # kaiming_normal, fan_out, relu (matches module init)
    w = std * jax.random.normal(rng.next(), (o, i, kh, kw), jnp.float32)
    b = jnp.zeros((o,), jnp.float32) if bias else None
    return _fuse(w, _bn_synth(o) if bn else None, b)


def make_convT(rng, i, o, kh, kw, *, bn=True, bias=False):
    std = (2.0 / (o * kh * kw)) ** 0.5
    w = std * jax.random.normal(rng.next(), (i, o, kh, kw), jnp.float32)   # torch layout (I,O,kh,kw)
    w_eq = jnp.transpose(w[:, :, ::-1, ::-1], (1, 0, 2, 3))                # equivalent OIHW conv
    b = jnp.zeros((o,), jnp.float32) if bias else None
    return _fuse(w_eq, _bn_synth(o) if bn else None, b)


def make_basic_block(rng, cin, cout, stride):
    p = {
        "stride": stride,
        "conv1": make_conv(rng, cout, cin, 3, 3),
        "conv2": make_conv(rng, cout, cout, 3, 3),
        "conv1_g": make_conv(rng, cout, cin, 3, 3),
        "conv2_g": make_conv(rng, cout, cout, 3, 3),
    }
    if stride != 1 or cin != cout:
        p["down"] = make_conv(rng, cout, cin, 1, 1)
        p["down_g"] = make_conv(rng, cout, cin, 1, 1)
    return p


def basic_block_fwd(p, xg):
    cin = xg.shape[-1] // 2
    x, g = xg[..., :cin], xg[..., cin:]

    def branch(inp, c1, c2, down):
        if down is not None:
            ident = conv2d(inp, down, stride=p["stride"], padding=0)
        else:
            ident = inp
        h = conv2d(inp, c1, stride=p["stride"], padding=1, act="relu")
        # residual added BEFORE the final relu (standard BasicBlock)
        return conv2d(h, c2, stride=1, padding=1, act="relu", residual=ident)

    ox = branch(x, p["conv1"], p["conv2"], p.get("down"))
    og = branch(g, p["conv1_g"], p["conv2_g"], p.get("down_g"))
    return jnp.concatenate([ox, og], axis=-1)


def make_dblock(rng, c):
    return {"d%d" % k: make_conv(rng, c, c, 3, 3, bn=False, bias=True) for k in range(1, 5)}


def dblock_fwd(p, x):
    d1 = conv2d(x, p["d1"], padding=1, dilation=1, act="relu")
    d2 = conv2d(d1, p["d2"], padding=2, dilation=2, act="relu")
    d3 = conv2d(d2, p["d3"], padding=4, dilation=4, act="relu")
    d4 = conv2d(d3, p["d4"], padding=8, dilation=8, act="relu")
    return ew_combine([x, d1, d2, d3, d4], op="add")


def make_decoder(rng, cin, cout):
    m = cin // 4
    return {
        "conv1": make_conv(rng, m, cin, 1, 1, bn=True, bias=True),
        "deconv2": make_convT(rng, m, m, 3, 3, bn=True, bias=True),
        "conv3": make_conv(rng, cout, m, 1, 1, bn=True, bias=True),
    }


def decoder_fwd(p, x, skip=None):
    h = conv2d(x, p["conv1"], act="relu")
    h = conv_transpose2d(h, p["deconv2"], stride=2, padding=1, output_padding=1, act="relu")
    # decoderN(x) + skip: the skip add happens AFTER the decoder's final relu,
    # fused here as a post-activation residual (saves a separate elementwise pass).
    return conv2d(h, p["conv3"], act="relu", residual=skip, res_after_act=True)


def make_resnet_params(seed=0, blocks_num=(1, 1, 1, 1), num_classes=1):
    rng = PRNG(seed)
    P = {}
    P["conv1"] = make_conv(rng, 64, 3, 7, 7)
    P["conv1_g"] = make_conv(rng, 64, 1, 7, 7)
    filters = [64, 128, 256, 512]
    in_c = 64
    layers = []
    for li, (ch, nb) in enumerate(zip(filters, blocks_num)):
        stride = 1 if li == 0 else 2
        blocks = [make_basic_block(rng, in_c, ch, stride)]
        in_c = ch
        for _ in range(1, nb):
            blocks.append(make_basic_block(rng, in_c, ch, 1))
        layers.append(blocks)
    P["layers"] = layers
    P["dblock"] = make_dblock(rng, 512)
    P["dblock_add"] = make_dblock(rng, 512)  # built but unused (matches reference forward)
    P["decoder4"] = make_decoder(rng, 512, 256)
    P["decoder3"] = make_decoder(rng, 256, 128)
    P["decoder2"] = make_decoder(rng, 128, 64)
    P["decoder1"] = make_decoder(rng, 64, 64)
    P["decoder4_add"] = make_decoder(rng, 512, 256)
    P["decoder3_add"] = make_decoder(rng, 256, 128)
    P["decoder2_add"] = make_decoder(rng, 128, 64)
    P["decoder1_add"] = make_decoder(rng, 64, 64)
    P["finaldeconv1"] = make_convT(rng, 64, 32, 4, 4, bn=False, bias=True)
    P["finalconv2"] = make_conv(rng, 32, 32, 3, 3, bn=False, bias=True)
    P["finalconv"] = make_conv(rng, num_classes, 64, 3, 3, bn=False, bias=True)
    return P


# --------------------------------------------------------------------------------------
# Forward pass (mirrors ResNet.forward from networks/Dlink34_condv.py)
# --------------------------------------------------------------------------------------
def resnet_forward(P, inputs_nchw):
    x_all = jnp.transpose(inputs_nchw, (0, 2, 3, 1)).astype(jnp.float32)  # -> NHWC
    Nb = x_all.shape[0]
    xi, gi = x_all[..., :3], x_all[..., 3:]

    out = conv2d(xi, P["conv1"], stride=2, padding=3, act="relu")
    out = maxpool_3x3_s2_p1(out)
    out_g = conv2d(gi, P["conv1_g"], stride=2, padding=3, act="relu")
    out_g = maxpool_3x3_s2_p1(out_g)
    h = jnp.concatenate([out, out_g], axis=-1)

    feats = []
    for blocks in P["layers"]:
        for b in blocks:
            h = basic_block_fwd(b, h)
        feats.append(h)
    x_1, x_2, x_3, x_4 = feats
    x_e1, g_e1 = x_1[..., :64], x_1[..., 64:]
    x_e2, g_e2 = x_2[..., :128], x_2[..., 128:]
    x_e3, g_e3 = x_3[..., :256], x_3[..., 256:]
    x_e4, g_e4 = x_4[..., :512], x_4[..., 512:]

    # both branches share P["dblock"] in the reference forward -> batch them
    c_all = dblock_fwd(P["dblock"], jnp.concatenate([x_e4, g_e4], axis=0))
    x_c, g_c = c_all[:Nb], c_all[Nb:]

    x_d4 = decoder_fwd(P["decoder4"], x_c, skip=x_e3)
    x_d3 = decoder_fwd(P["decoder3"], x_d4, skip=x_e2)
    x_d2 = decoder_fwd(P["decoder2"], x_d3, skip=x_e1)
    x_d1 = decoder_fwd(P["decoder1"], x_d2)

    g_d4 = decoder_fwd(P["decoder4_add"], g_c, skip=g_e3)
    g_d3 = decoder_fwd(P["decoder3_add"], g_d4, skip=g_e2)
    g_d2 = decoder_fwd(P["decoder2_add"], g_d3, skip=g_e1)
    g_d1 = decoder_fwd(P["decoder1_add"], g_d2)

    # finaldeconv1 / finalconv2 are shared between the two branches -> batch them
    d1 = jnp.concatenate([x_d1, g_d1], axis=0)
    o = conv_transpose2d(d1, P["finaldeconv1"], stride=2, padding=1, act="relu")
    o = conv2d(o, P["finalconv2"], padding=1, act="relu")
    x_out, g_out = o[:Nb], o[Nb:]

    cat = jnp.concatenate([x_out, g_out], axis=-1)
    out = conv2d(cat, P["finalconv"], padding=1, act="sigmoid")
    return jnp.transpose(out, (0, 3, 1, 2))  # back to NCHW


if __name__ == "__main__":
    key = jax.random.PRNGKey(0)
    # input: batch=2, 4 channels (3 RGB + 1 guidance), 32x32 spatial (divisible by 32)
    inputs = jax.random.normal(key, (2, 4, 32, 32), jnp.float32)
    params = make_resnet_params(seed=0, blocks_num=(1, 1, 1, 1), num_classes=1)
    out = resnet_forward(params, inputs)
    out = jax.block_until_ready(out)
    assert out.shape == (2, 1, 32, 32)
    assert bool(jnp.all(jnp.isfinite(out))) and bool(jnp.all((out >= 0) & (out <= 1)))
    print("KERNEL_OK")
</pallas_src>

<mosaic_0001>
module attributes {stable_mosaic.version = 11 : i64} {
  func.func @_mm_kernel(%arg0: i32, %arg1: i32, %arg2: memref<256x147xbf16, #tpu.memory_space<vmem>>, %arg3: memref<147x128xbf16, #tpu.memory_space<vmem>>, %arg4: memref<1x128xf32, #tpu.memory_space<vmem>>, %arg5: memref<1x128xf32, #tpu.memory_space<vmem>>, %arg6: memref<256x128xf32, #tpu.memory_space<vmem>>) attributes {dimension_semantics = [#tpu.dimension_semantics<parallel>, #tpu.dimension_semantics<parallel>], iteration_bounds = array<i64: 2, 1>, scalar_prefetch = 0 : i64, scratch_operands = 0 : i64, tpu.core_type = #tpu.core_type<tc>, window_params = [{transform_indices = @transform_0, window_bounds = array<i64: 256, 147>}, {transform_indices = @transform_1, window_bounds = array<i64: 147, 128>}, {transform_indices = @transform_2, window_bounds = array<i64: 1, 128>}, {transform_indices = @transform_3, window_bounds = array<i64: 1, 128>}, {transform_indices = @transform_4, window_bounds = array<i64: 256, 128>}]} {
    %c0 = arith.constant 0 : index
    %c0_0 = arith.constant 0 : index
    %0 = vector.load %arg2[%c0, %c0_0] : memref<256x147xbf16, #tpu.memory_space<vmem>>, vector<256x147xbf16>
    %c0_1 = arith.constant 0 : index
    %c0_2 = arith.constant 0 : index
    %1 = vector.load %arg3[%c0_1, %c0_2] : memref<147x128xbf16, #tpu.memory_space<vmem>>, vector<147x128xbf16>
    %cst = arith.constant dense<0.000000e+00> : vector<256x128xf32>
    %2 = tpu.matmul %0, %1, %cst {dimension_numbers = #tpu.dot_dimension_numbers<[1], [0], [0], [1], [0, 0, 1, 1], [], []>} : vector<256x147xbf16>, vector<147x128xbf16>, vector<256x128xf32> -> vector<256x128xf32>
    %c0_3 = arith.constant 0 : index
    %c0_4 = arith.constant 0 : index
    %3 = vector.load %arg4[%c0_3, %c0_4] : memref<1x128xf32, #tpu.memory_space<vmem>>, vector<1x128xf32>
    %4 = vector.broadcast %3 : vector<1x128xf32> to vector<256x128xf32>
    %5 = arith.mulf %2, %4 : vector<256x128xf32>
    %c0_5 = arith.constant 0 : index
    %c0_6 = arith.constant 0 : index
    %6 = vector.load %arg5[%c0_5, %c0_6] : memref<1x128xf32, #tpu.memory_space<vmem>>, vector<1x128xf32>
    %7 = vector.broadcast %6 : vector<1x128xf32> to vector<256x128xf32>
    %8 = arith.addf %5, %7 : vector<256x128xf32>
    %cst_7 = arith.constant 0.000000e+00 : f32
    %9 = vector.broadcast %cst_7 : f32 to vector<256x128xf32>
    %10 = arith.maximumf %8, %9 : vector<256x128xf32>
    %c0_8 = arith.constant 0 : index
    %c0_9 = arith.constant 0 : index
    %11 = vector.load %arg6[%c0_8, %c0_9] : memref<256x128xf32, #tpu.memory_space<vmem>>, vector<256x128xf32>
    tpu.vector_store %arg6[%c0_8, %c0_9], %10 {strides = array<i32>} : memref<256x128xf32, #tpu.memory_space<vmem>>, vector<256x128xf32>,
    return
  }
  func.func @transform_0(%arg0: i32, %arg1: i32) -> (i32, i32) {
    %c0_i32 = arith.constant 0 : i32
    %c0_i32_0 = arith.constant 0 : i32
    return %arg0, %c0_i32 : i32, i32
  }
  func.func @transform_1(%arg0: i32, %arg1: i32) -> (i32, i32) {
    %c0_i32 = arith.constant 0 : i32
    %c0_i32_0 = arith.constant 0 : i32
    return %c0_i32, %arg1 : i32, i32
  }
  func.func @transform_2(%arg0: i32, %arg1: i32) -> (i32, i32) {
    %c0_i32 = arith.constant 0 : i32
    %c0_i32_0 = arith.constant 0 : i32
    return %c0_i32, %arg1 : i32, i32
  }
  func.func @transform_3(%arg0: i32, %arg1: i32) -> (i32, i32) {
    %c0_i32 = arith.constant 0 : i32
    %c0_i32_0 = arith.constant 0 : i32
    return %c0_i32, %arg1 : i32, i32
  }
  func.func @transform_4(%arg0: i32, %arg1: i32) -> (i32, i32) {
    %c0_i32 = arith.constant 0 : i32
    return %arg0, %arg1 : i32, i32
  }
}

</mosaic_0001>

<bundles_post_ra>
// kernel: tpu_custom_call.1
= control target key start
LH: loop header
LB: loop body
LE: loop exit
PB: predicated region body
PF: predicated region fallthrough
CT: control target
= control target key end

     0   :  { %9 = vsyncpa [#allocation3], 0  ;;  %s1629_s0 = inlined_call_operand.vmem [shape: bf16[512,147], index: 0, kind: input, shape index: {}]   ;;  %s1630_s1 = inlined_call_operand.vmem [shape: bf16[147,128], index: 1, kind: input, shape index: {}]   ;;  %s1631_s2 = inlined_call_operand.vmem [shape: f32[1,128], index: 2, kind: input, shape index: {}]   ;;  %s1632_s3 = inlined_call_operand.vmem [shape: f32[1,128], index: 3, kind: input, shape index: {}]   ;;  %s1633_s4 = inlined_call_operand.hbm [shape: f32[512,128], index: 4, kind: output, shape index: {}]  }
   0x1   :  { %11 = vsyncpa [#allocation3 + $0x1], 0  ;;  %s1323_s15 = smov 0   ;;  %s1325_s16 = smov 0  }
   0x2   :  { %s1327_s17 = smov 0   ;;  %s1329_s18 = smov 0  }
   0x3   :  { %s1331_s19 = smov 0   ;;  %s1333_s20 = smov 0  }
   0x4 LB: > { %s999_s21 = sadd.s32 4294967295, %s1291_s20   ;;  %s1000_s22 = sadd.s32 4294967294, %s1291_s20   ;;  %s1291_s20 = sphi %s1333_s20, %s17_s20   ;;  %s1287_s19 = sphi %s1331_s19, %s1640_s19   ;;  %s1283_s18 = sphi %s1329_s18, %s1639_s18   ;;  %s1279_s17 = sphi %s1327_s17, %s1638_s17   ;;  %s1275_s16 = sphi %s1325_s16, %s1637_s16   ;;  %s1271_s15 = sphi %s1323_s15, %s1636_s15  }
   0x5   : > { %s29_s23 = sadd.s32 1, %s1287_s19  ;;  %s142_s24 = sadd.s32 1, %s1279_s17 }
   0x6   : > { %p31_p0 = scmp.ge.s32.totalorder %s29_s23, 2  ;;  %p152_p1 = scmp.ne.s32.totalorder %s1279_s17, %s1275_s16 }
   0x7   : > { %p153_p2 = scmp.eq.s32.totalorder %s999_s21, 1  ;;  %p158_p3 = scmp.ne.s32.totalorder %s1275_s16, %s1271_s15 }
   0x8   : > { %s1642_s23 = smov (%p31_p0, %s29_s23), 0  ;;  %p159_p5 = scmp.eq.s32.totalorder %s1000_s22, 1 }
   0x9   : > { %p1363_p4 = por %p153_p2, %p152_p1  ;;  %s137_s26 = ssub.s32 %s1287_s19, %s1642_s23 }
   0xa   : > { %p1006_p6 = scmp.ge.s32.totalorder %s1291_s20, 1  ;;  %p140_p7 = scmp.eq.s32.totalorder %s137_s26, 0 }
   0xb   : > { %p1370_p8 = por %p159_p5, %p158_p3  ;;  %p206_p9 = scmp.lt.s32.totalorder %s1291_s20, 3 }
   0xc   : > { %s1376_s28 = scalar_select %p140_p7, %s1279_s17, %s142_s24  }
   0xd   : > { %p207_p10 = pnand %p1006_p6, %p206_p9 }
   0xe   : > { %s1008_s9 = sshll.u32 (!%p207_p10), %s1283_s18, 5  ;;  %s1077_s29 = sshll.u32 (!%p207_p10), %s1283_s18, 12 }
   0xf   : > { %210 = sbr.rel (%p207_p10) target bundleno = 334 (0x14e), region = 36  ;;  %p244_p11 = scmp.lt.s32.totalorder (!%p207_p10), %s1008_s9, 63 }
  0x10   : > { %s1576_s7 = scalar_lea.hbm (!%p207_p10), %s1633_s4, %s1077_s29 }
  0x14   : > { %v1157_v0 = vld [vmem:[%s1630_s1 + $0x38] sm:$0xff]   ;;  %v1293_v1 = vmov 0   ;;  %v1158_v2 = vld [vmem:[%s1630_s1 + $0x30] sm:$0xff]   ;;  %v1159_v3 = vld [vmem:[%s1630_s1 + $0x28] sm:$0xff]   ;;  %s1644_s9 = smov (!%p244_p11, %s1008_s9), 63  ;;  %vm514_vm0 = vcmask 154624  }
  0x15   : > { %570 = vmatprep.subr.bf16.mxu0 %v1293_v1  ;;  %1078 = vmatprep.subr.bf16.mxu1 %v1293_v1  ;;  %v1160_v4 = vld [vmem:[%s1630_s1 + $0x20] sm:$0xff]   ;;  %s1076_s12 = sshll.u32 %s1644_s9, 3  ;;  %v1161_v5 = vld [vmem:[%s1630_s1 + $0x18] sm:$0xff]   ;;  %v1162_v8 = vld [vmem:[%s1630_s1 + $0x10] sm:$0xff]   ;;  %vm563_vm1 = vcmask 1040384   ;;  %vm564_vm2 = vcmask 1041408  }
  0x16   : > { %571 = vmatpush1.bf16.msra.mxu0 %v1157_v0  ;;  %1088 = vmatpush1.bf16.msra.mxu1 %v1157_v0  ;;  %s1394_s21 = scalar_lea.vmem %s1629_s0, %s1076_s12  ;;  %v1163_v9 = vld [vmem:[%s1630_s1 + $0x8] sm:$0xff]   ;;  %v1294_v10 = vmov 65535   ;;  %v1164_v12 = vld [vmem:[%s1630_s1] sm:$0xff]   ;;  %s240_s12 = sand.u32 1, %s1275_s16  }
  0x17   : > { %572 = vmatprep.subr.bf16.mxu0 %v1293_v1  ;;  %1079 = vmatprep.subr.bf16.mxu1 %v1293_v1  ;;  %v1169_v6 = vld [vmem:[%s1394_s21 + $0x4] ss:$8 sps:$4 sm:$0xff]   ;;  %v565_v11 = vsel %vm563_vm1, 4294967295, %v1294_v10  ;;  %v1165_v13 = vld [vmem:[%s1630_s1 + $0x48] ss:$0 sps:$4 sm:$0x33]  }
  0x18   : > { %v1172_v7 = vld [vmem:[%s1394_s21 + $0x84] ss:$8 sps:$4 sm:$0xff]   ;;  %1053 = vmatprep.mubr.msk.bf16.mxu0 %vm514_vm0, %v1169_v6  ;;  %v566_v14 = vsel %vm564_vm2, %v565_v11, 0  ;;  %v1167_v17 = vld [vmem:[%s1394_s21] ss:$8 sps:$4 sm:$0xff]   ;;  %s1007_s26 = sshll.u32 %s240_s12, 8 }
  0x19   : > { %1061 = vmatprep.mubr.msk.bf16.mxu1 %vm514_vm0, %v1172_v7  ;;  %v568_v15 = vand.u32 %v1165_v13, %v566_v14  ;;  %v1166_v16 = vld [vmem:[%s1630_s1 + $0x40] sm:$0xff]   ;;  %v1173_v19 = vld [vmem:[%s1394_s21 + $0x14] ss:$8 sps:$4 sm:$0xff]   ;;  %v1177_v21 = vld [vmem:[%s1394_s21 + $0x10] ss:$8 sps:$4 sm:$0xff]   ;;  %s1584_s18 = scalar_lea.sflag [#allocation3], %s240_s12 }
  0x1a   : > { %573 = vmatpush1.bf16.msra.mxu0 %v1158_v2  ;;  %1089 = vmatpush1.bf16.msra.mxu1 %v1158_v2  ;;  %v1170_v18 = vld [vmem:[%s1394_s21 + $0x80] ss:$8 sps:$4 sm:$0xff]   ;;  %v1175_v20 = vld [vmem:[%s1394_s21 + $0x94] ss:$8 sps:$4 sm:$0xff]   ;;  %v1178_v22 = vld [vmem:[%s1394_s21 + $0x90] ss:$8 sps:$4 sm:$0xff]  }
  0x1b   : > { %574 = vmatprep.subr.bf16.mxu0 %v1293_v1  ;;  %1080 = vmatprep.subr.bf16.mxu1 %v1293_v1  ;;  %v1179_v23 = vld [vmem:[%s1394_s21 + $0x24] ss:$8 sps:$4 sm:$0xff]   ;;  %v1183_v25 = vld [vmem:[%s1394_s21 + $0x20] ss:$8 sps:$4 sm:$0xff]   ;;  %v1185_v27 = vld [vmem:[%s1394_s21 + $0x34] ss:$8 sps:$4 sm:$0xff]  }
  0x1c   : > { %v1181_v24 = vld [vmem:[%s1394_s21 + $0xa4] ss:$8 sps:$4 sm:$0xff]   ;;  %v1184_v26 = vld [vmem:[%s1394_s21 + $0xa0] ss:$8 sps:$4 sm:$0xff]   ;;  %v1187_v28 = vld [vmem:[%s1394_s21 + $0xb4] ss:$8 sps:$4 sm:$0xff]  }
  0x1d   : > { %v1189_v29 = vld [vmem:[%s1394_s21 + $0x30] ss:$8 sps:$4 sm:$0xff]   ;;  %v1191_v31 = vld [vmem:[%s1394_s21 + $0x44] ss:$8 sps:$4 sm:$0xff]   ;;  %v1195_v33 = vld [vmem:[%s1394_s21 + $0x40] ss:$8 sps:$4 sm:$0xff]  }
  0x1e   : > { %575 = vmatpush1.bf16.msra.mxu0 %v1159_v3  ;;  %1090 = vmatpush1.bf16.msra.mxu1 %v1159_v3  ;;  %v1190_v30 = vld [vmem:[%s1394_s21 + $0xb0] ss:$8 sps:$4 sm:$0xff]   ;;  %v1193_v32 = vld [vmem:[%s1394_s21 + $0xc4] ss:$8 sps:$4 sm:$0xff]   ;;  %v1196_v34 = vld [vmem:[%s1394_s21 + $0xc0] ss:$8 sps:$4 sm:$0xff]  }
  0x1f   : > { %576 = vmatprep.subr.bf16.mxu0 %v1293_v1  ;;  %1081 = vmatprep.subr.bf16.mxu1 %v1293_v1  ;;  %v1197_v35 = vld [vmem:[%s1394_s21 + $0x54] ss:$8 sps:$4 sm:$0xff]   ;;  %v1201_v37 = vld [vmem:[%s1394_s21 + $0x50] ss:$8 sps:$4 sm:$0xff]   ;;  %v1203_v39 = vld [vmem:[%s1394_s21 + $0x64] ss:$8 sps:$4 sm:$0xff]  }
  0x20   : > { %v1199_v36 = vld [vmem:[%s1394_s21 + $0xd4] ss:$8 sps:$4 sm:$0xff]   ;;  %v1202_v38 = vld [vmem:[%s1394_s21 + $0xd0] ss:$8 sps:$4 sm:$0xff]   ;;  %v1205_v40 = vld [vmem:[%s1394_s21 + $0xe4] ss:$8 sps:$4 sm:$0xff]  }
  0x21   : > { %v1207_v41 = vld [vmem:[%s1394_s21 + $0x60] ss:$8 sps:$4 sm:$0xff]   ;;  %v1209_v43 = vld [vmem:[%s1394_s21 + $0x74] ss:$8 sps:$4 sm:$0xff]   ;;  %v1213_v45 = vld [vmem:[%s1394_s21 + $0x70] ss:$8 sps:$4 sm:$0xff]  }
  0x22   : > { %577 = vmatpush1.bf16.msra.mxu0 %v1160_v4  ;;  %1091 = vmatpush1.bf16.msra.mxu1 %v1160_v4  ;;  %v1208_v42 = vld [vmem:[%s1394_s21 + $0xe0] ss:$8 sps:$4 sm:$0xff]   ;;  %v1211_v44 = vld [vmem:[%s1394_s21 + $0xf4] ss:$8 sps:$4 sm:$0xff]   ;;  %v1214_v46 = vld [vmem:[%s1394_s21 + $0xf0] ss:$8 sps:$4 sm:$0xff]  }
  0x23   : > { %578 = vmatprep.subr.bf16.mxu0 %v1293_v1  ;;  %1082 = vmatprep.subr.bf16.mxu1 %v1293_v1  ;;  %v1466_v47 = vld [vmem:[%s1631_s2] ss:$0 sm:$0xff]  ;;  %s1481_s21 = scalar_lea.vmem [#allocation2], %s1007_s26  ;;  %s1295_s9 = smov [#allocation2]  }
  0x24   : > { %v1471_v49 = vld [vmem:[%s1632_s3] ss:$0 sm:$0xff]  ;;  %s888_s30 = sshll.u32 %s1481_s21, 4  ;;  %s1219_s10 = sshll.u32 %s1295_s9, 4  ;;  %s1578_s30 = int_to_ptr.vmem [resolvable:$true] %s888_s30  ;;  %s1220_s10 = int_to_ptr.vmem [resolvable:$false] %s1219_s10 }
  0x25   : > { %s1215_s8 = scalar_lea.vmem %s1578_s30, 4096  ;;  %s1221_s11 = scalar_lea.vmem %s1220_s10, 8192 }
  0x26   : > { %579 = vmatpush1.bf16.msra.mxu0 %v1161_v5  ;;  %1092 = vmatpush1.bf16.msra.mxu1 %v1161_v5  ;;  %p1216_p12 = scmp.ne.s32.totalorder %s1578_s30, %s1215_s8  ;;  %p1222_p1 = scmp.lt.s32.totalorder %s1578_s30, %s1220_s10 }
  0x27   : > { %580 = vmatprep.subr.bf16.mxu0 %v1293_v1  ;;  %1083 = vmatprep.subr.bf16.mxu1 %v1293_v1  ;;  %p1223_p2 = scmp.lt.s32.totalorder %s1221_s11, %s1215_s8 }
  0x28   : > { %p1217_p13 = pnand %p1216_p12, %p1363_p4 }
  0x29   : > { %p1224_p3 = por %p1223_p2, %p1222_p1 }
  0x2a   : > { %581 = vmatpush1.bf16.msra.mxu0 %v1162_v8  ;;  %1093 = vmatpush1.bf16.msra.mxu1 %v1162_v8  ;;  %p1218_p0 = pneg %p1217_p13 }
  0x2b   : > { %582 = vmatprep.subr.bf16.mxu0 %v1293_v1  ;;  %1084 = vmatprep.subr.bf16.mxu1 %v1293_v1 }
  0x2c   : > { %p1225_p5 = pnand %p1224_p3, %p1218_p0 }
  0x2e   : > { %583 = vmatpush1.bf16.msra.mxu0 %v1163_v9  ;;  %1094 = vmatpush1.bf16.msra.mxu1 %v1163_v9 }
  0x2f   : > { %584 = vmatprep.subr.bf16.mxu0 %v1293_v1  ;;  %1085 = vmatprep.subr.bf16.mxu1 %v1293_v1 }
  0x32   : > { %585 = vmatpush1.bf16.msra.mxu0 %v1164_v12  ;;  %1095 = vmatpush1.bf16.msra.mxu1 %v1164_v12 }
  0x33   : > { %598 = vmatprep.subr.bf16.mxu0 %v1293_v1  ;;  %1086 = vmatprep.subr.bf16.mxu1 %v1293_v1 }
  0x36   : > { %599 = vmatpush2.bf16.msra.mxu0 %v568_v15  ;;  %1096 = vmatpush2.bf16.msra.mxu1 %v568_v15 }
  0x37   : > { %600 = vmatprep.subr.bf16.mxu0 %v1293_v1  ;;  %1087 = vmatprep.subr.bf16.mxu1 %v1293_v1 }
  0x3a   : > { %601 = vmatpush2.bf16.msra.mxu0 %v1166_v16  ;;  %1097 = vmatpush2.bf16.msra.mxu1 %v1166_v16 }
  0x3d   : > { %603 = vmatmul.mubr.bf16.vlgmr.msra.gmra.mxu0 %v1167_v17  ;;  %667 = vmatmul.mubr.bf16.vlgmr.msra.gmra.mxu1 %v1170_v18 }
  0x3e   : > { %1054 = vmatprep.mubr.msk.bf16.mxu0 %vm514_vm0, %v1173_v19  ;;  %1062 = vmatprep.mubr.msk.bf16.mxu1 %vm514_vm0, %v1175_v20 }
  0x45   : > { %611 = vmatmul.mubr.bf16.gmra.mxu0 %v1177_v21  ;;  %675 = vmatmul.mubr.bf16.gmra.mxu1 %v1178_v22 }
  0x46   : > { %1055 = vmatprep.mubr.msk.bf16.mxu0 %vm514_vm0, %v1179_v23  ;;  %1063 = vmatprep.mubr.msk.bf16.mxu1 %vm514_vm0, %v1181_v24 }
  0x4d   : > { %619 = vmatmul.mubr.bf16.gmra.mxu0 %v1183_v25  ;;  %683 = vmatmul.mubr.bf16.gmra.mxu1 %v1184_v26 }
  0x4e   : > { %1056 = vmatprep.mubr.msk.bf16.mxu0 %vm514_vm0, %v1185_v27  ;;  %1064 = vmatprep.mubr.msk.bf16.mxu1 %vm514_vm0, %v1187_v28 }
  0x55   : > { %627 = vmatmul.mubr.bf16.gmra.mxu0 %v1189_v29  ;;  %691 = vmatmul.mubr.bf16.gmra.mxu1 %v1190_v30 }
  0x56   : > { %1057 = vmatprep.mubr.msk.bf16.mxu0 %vm514_vm0, %v1191_v31  ;;  %1065 = vmatprep.mubr.msk.bf16.mxu1 %vm514_vm0, %v1193_v32 }
  0x5d   : > { %635 = vmatmul.mubr.bf16.gmra.mxu0 %v1195_v33  ;;  %699 = vmatmul.mubr.bf16.gmra.mxu1 %v1196_v34 }
  0x5e   : > { %1058 = vmatprep.mubr.msk.bf16.mxu0 %vm514_vm0, %v1197_v35  ;;  %1066 = vmatprep.mubr.msk.bf16.mxu1 %vm514_vm0, %v1199_v36 }
  0x65   : > { %643 = vmatmul.mubr.bf16.gmra.mxu0 %v1201_v37  ;;  %707 = vmatmul.mubr.bf16.gmra.mxu1 %v1202_v38 }
  0x66   : > { %1059 = vmatprep.mubr.msk.bf16.mxu0 %vm514_vm0, %v1203_v39  ;;  %1067 = vmatprep.mubr.msk.bf16.mxu1 %vm514_vm0, %v1205_v40 }
  0x6d   : > { %651 = vmatmul.mubr.bf16.gmra.mxu0 %v1207_v41  ;;  %715 = vmatmul.mubr.bf16.gmra.mxu1 %v1208_v42 }
  0x6e   : > { %1060 = vmatprep.mubr.msk.bf16.mxu0 %vm514_vm0, %v1209_v43  ;;  %1068 = vmatprep.mubr.msk.bf16.mxu1 %vm514_vm0, %v1211_v44 }
  0x75   : > { %659 = vmatmul.mubr.bf16.gmra.mxu0 %v1213_v45  ;;  %723 = vmatmul.mubr.bf16.gmra.mxu1 %v1214_v46 }
  0xfd   : > { %v604_v48 = vpop.f32.mrf.mxu0  ;;  %v668_v50 = vpop.f32.mrf.mxu1 }
  0xfe   : > { %v738_v51 = vmul.f32 %v1466_v47, %v604_v48  ;;  %v754_v52 = vmul.f32 %v1466_v47, %v668_v50 }
  0xff   : > { %v606_v53 = vpop.f32.mrf.mxu0  ;;  %v670_v54 = vpop.f32.mrf.mxu1 }
 0x100   : > { %v777_v55 = vadd.f32 %v1471_v49, %v738_v51  ;;  %v793_v56 = vadd.f32 %v1471_v49, %v754_v52 }
 0x101   : > { %v607_v57 = vpop.f32.mrf.mxu0  ;;  %v671_v58 = vpop.f32.mrf.mxu1 }
 0x102   : > { %v809_v59 = vmax.f32 %v777_v55, 0.0  ;;  %v825_v60 = vmax.f32 %v793_v56, 0.0  ;;  %v739_v61 = vmul.f32 %v1466_v47, %v607_v57  ;;  %v755_v62 = vmul.f32 %v1466_v47, %v671_v58 }
 0x103   : > { %v609_v63 = vpop.f32.mrf.mxu0  ;;  %v673_v0 = vpop.f32.mrf.mxu1 }
 0x104   : > { %841 = vst [vmem:[%s1481_s21] sm:$0xff] %v809_v59  ;;  %857 = vst [vmem:[%s1481_s21 + $0x80] sm:$0xff] %v825_v60  ;;  %v778_v1 = vadd.f32 %v1471_v49, %v739_v61  ;;  %v794_v2 = vadd.f32 %v1471_v49, %v755_v62 }
 0x105   : > { %v612_v3 = vpop.f32.mrf.mxu0  ;;  %v676_v4 = vpop.f32.mrf.mxu1 }
 0x106   : > { %v810_v5 = vmax.f32 %v778_v1, 0.0  ;;  %v826_v6 = vmax.f32 %v794_v2, 0.0  ;;  %v740_v7 = vmul.f32 %v1466_v47, %v612_v3  ;;  %v756_v8 = vmul.f32 %v1466_v47, %v676_v4 }
 0x107   : > { %v614_v9 = vpop.f32.mrf.mxu0  ;;  %v678_v10 = vpop.f32.mrf.mxu1 }
 0x108   : > { %842 = vst [vmem:[%s1481_s21 + $0x8] sm:$0xff] %v810_v5  ;;  %858 = vst [vmem:[%s1481_s21 + $0x88] sm:$0xff] %v826_v6  ;;  %v779_v11 = vadd.f32 %v1471_v49, %v740_v7  ;;  %v795_v12 = vadd.f32 %v1471_v49, %v756_v8 }
 0x109   : > { %v615_v13 = vpop.f32.mrf.mxu0  ;;  %v679_v14 = vpop.f32.mrf.mxu1 }
 0x10a   : > { %v811_v15 = vmax.f32 %v779_v11, 0.0  ;;  %v827_v16 = vmax.f32 %v795_v12, 0.0  ;;  %v741_v17 = vmul.f32 %v1466_v47, %v615_v13  ;;  %v757_v18 = vmul.f32 %v1466_v47, %v679_v14 }
 0x10b   : > { %v617_v19 = vpop.f32.mrf.mxu0  ;;  %v681_v20 = vpop.f32.mrf.mxu1 }
 0x10c   : > { %843 = vst [vmem:[%s1481_s21 + $0x10] sm:$0xff] %v811_v15  ;;  %859 = vst [vmem:[%s1481_s21 + $0x90] sm:$0xff] %v827_v16  ;;  %v780_v21 = vadd.f32 %v1471_v49, %v741_v17  ;;  %v796_v22 = vadd.f32 %v1471_v49, %v757_v18 }
 0x10d   : > { %v620_v23 = vpop.f32.mrf.mxu0  ;;  %v684_v24 = vpop.f32.mrf.mxu1 }
 0x10e   : > { %v812_v25 = vmax.f32 %v780_v21, 0.0  ;;  %v828_v26 = vmax.f32 %v796_v22, 0.0  ;;  %v742_v27 = vmul.f32 %v1466_v47, %v620_v23  ;;  %v758_v28 = vmul.f32 %v1466_v47, %v684_v24 }
 0x10f   : > { %v622_v29 = vpop.f32.mrf.mxu0  ;;  %v686_v30 = vpop.f32.mrf.mxu1 }
 0x110   : > { %844 = vst [vmem:[%s1481_s21 + $0x18] sm:$0xff] %v812_v25  ;;  %860 = vst [vmem:[%s1481_s21 + $0x98] sm:$0xff] %v828_v26  ;;  %v781_v31 = vadd.f32 %v1471_v49, %v742_v27  ;;  %v797_v32 = vadd.f32 %v1471_v49, %v758_v28 }
 0x111   : > { %v623_v33 = vpop.f32.mrf.mxu0  ;;  %v687_v34 = vpop.f32.mrf.mxu1 }
 0x112   : > { %v813_v35 = vmax.f32 %v781_v31, 0.0  ;;  %v829_v36 = vmax.f32 %v797_v32, 0.0  ;;  %v743_v37 = vmul.f32 %v1466_v47, %v623_v33  ;;  %v759_v38 = vmul.f32 %v1466_v47, %v687_v34 }
 0x113   : > { %v625_v39 = vpop.f32.mrf.mxu0  ;;  %v689_v40 = vpop.f32.mrf.mxu1 }
 0x114   : > { %845 = vst [vmem:[%s1481_s21 + $0x20] sm:$0xff] %v813_v35  ;;  %861 = vst [vmem:[%s1481_s21 + $0xa0] sm:$0xff] %v829_v36  ;;  %v782_v41 = vadd.f32 %v1471_v49, %v743_v37  ;;  %v798_v42 = vadd.f32 %v1471_v49, %v759_v38 }
 0x115   : > { %v628_v43 = vpop.f32.mrf.mxu0  ;;  %v692_v44 = vpop.f32.mrf.mxu1 }
 0x116   : > { %v814_v45 = vmax.f32 %v782_v41, 0.0  ;;  %v830_v46 = vmax.f32 %v798_v42, 0.0  ;;  %v744_v48 = vmul.f32 %v1466_v47, %v628_v43  ;;  %v760_v50 = vmul.f32 %v1466_v47, %v692_v44 }
 0x117   : > { %v630_v51 = vpop.f32.mrf.mxu0  ;;  %v694_v52 = vpop.f32.mrf.mxu1 }
 0x118   : > { %846 = vst [vmem:[%s1481_s21 + $0x28] sm:$0xff] %v814_v45  ;;  %862 = vst [vmem:[%s1481_s21 + $0xa8] sm:$0xff] %v830_v46  ;;  %v783_v53 = vadd.f32 %v1471_v49, %v744_v48  ;;  %v799_v54 = vadd.f32 %v1471_v49, %v760_v50 }
 0x119   : > { %v631_v55 = vpop.f32.mrf.mxu0  ;;  %v695_v56 = vpop.f32.mrf.mxu1 }
 0x11a   : > { %v815_v57 = vmax.f32 %v783_v53, 0.0  ;;  %v831_v58 = vmax.f32 %v799_v54, 0.0  ;;  %v745_v59 = vmul.f32 %v1466_v47, %v631_v55  ;;  %v761_v60 = vmul.f32 %v1466_v47, %v695_v56 }
 0x11b   : > { %v633_v61 = vpop.f32.mrf.mxu0  ;;  %v697_v62 = vpop.f32.mrf.mxu1 }
 0x11c   : > { %847 = vst [vmem:[%s1481_s21 + $0x30] sm:$0xff] %v815_v57  ;;  %863 = vst [vmem:[%s1481_s21 + $0xb0] sm:$0xff] %v831_v58  ;;  %v784_v63 = vadd.f32 %v1471_v49, %v745_v59  ;;  %v800_v0 = vadd.f32 %v1471_v49, %v761_v60 }
 0x11d   : > { %v636_v1 = vpop.f32.mrf.mxu0  ;;  %v700_v2 = vpop.f32.mrf.mxu1 }
 0x11e   : > { %v816_v3 = vmax.f32 %v784_v63, 0.0  ;;  %v832_v4 = vmax.f32 %v800_v0, 0.0  ;;  %v746_v5 = vmul.f32 %v1466_v47, %v636_v1  ;;  %v762_v6 = vmul.f32 %v1466_v47, %v700_v2 }
 0x11f   : > { %v638_v7 = vpop.f32.mrf.mxu0  ;;  %v702_v8 = vpop.f32.mrf.mxu1 }
 0x120   : > { %848 = vst [vmem:[%s1481_s21 + $0x38] sm:$0xff] %v816_v3  ;;  %864 = vst [vmem:[%s1481_s21 + $0xb8] sm:$0xff] %v832_v4  ;;  %v785_v9 = vadd.f32 %v1471_v49, %v746_v5  ;;  %v801_v10 = vadd.f32 %v1471_v49, %v762_v6 }
 0x121   : > { %v639_v11 = vpop.f32.mrf.mxu0  ;;  %v703_v12 = vpop.f32.mrf.mxu1 }
 0x122   : > { %v817_v13 = vmax.f32 %v785_v9, 0.0  ;;  %v833_v14 = vmax.f32 %v801_v10, 0.0  ;;  %v747_v15 = vmul.f32 %v1466_v47, %v639_v11  ;;  %v763_v16 = vmul.f32 %v1466_v47, %v703_v12 }
 0x123   : > { %v641_v17 = vpop.f32.mrf.mxu0  ;;  %v705_v18 = vpop.f32.mrf.mxu1 }
 0x124   : > { %849 = vst [vmem:[%s1481_s21 + $0x40] sm:$0xff] %v817_v13  ;;  %865 = vst [vmem:[%s1481_s21 + $0xc0] sm:$0xff] %v833_v14  ;;  %v786_v19 = vadd.f32 %v1471_v49, %v747_v15  ;;  %v802_v20 = vadd.f32 %v1471_v49, %v763_v16 }
 0x125   : > { %v644_v21 = vpop.f32.mrf.mxu0  ;;  %v708_v22 = vpop.f32.mrf.mxu1 }
 0x126   : > { %v818_v23 = vmax.f32 %v786_v19, 0.0  ;;  %v834_v24 = vmax.f32 %v802_v20, 0.0  ;;  %v748_v25 = vmul.f32 %v1466_v47, %v644_v21  ;;  %v764_v26 = vmul.f32 %v1466_v47, %v708_v22 }
 0x127   : > { %v646_v27 = vpop.f32.mrf.mxu0  ;;  %v710_v28 = vpop.f32.mrf.mxu1 }
 0x128   : > { %850 = vst [vmem:[%s1481_s21 + $0x48] sm:$0xff] %v818_v23  ;;  %866 = vst [vmem:[%s1481_s21 + $0xc8] sm:$0xff] %v834_v24  ;;  %v787_v29 = vadd.f32 %v1471_v49, %v748_v25  ;;  %v803_v30 = vadd.f32 %v1471_v49, %v764_v26 }
 0x129   : > { %v647_v31 = vpop.f32.mrf.mxu0  ;;  %v711_v32 = vpop.f32.mrf.mxu1 }
 0x12a   : > { %v819_v33 = vmax.f32 %v787_v29, 0.0  ;;  %v835_v34 = vmax.f32 %v803_v30, 0.0  ;;  %v749_v35 = vmul.f32 %v1466_v47, %v647_v31  ;;  %v765_v36 = vmul.f32 %v1466_v47, %v711_v32 }
 0x12b   : > { %v649_v37 = vpop.f32.mrf.mxu0  ;;  %v713_v38 = vpop.f32.mrf.mxu1 }
 0x12c   : > { %851 = vst [vmem:[%s1481_s21 + $0x50] sm:$0xff] %v819_v33  ;;  %867 = vst [vmem:[%s1481_s21 + $0xd0] sm:$0xff] %v835_v34  ;;  %v788_v39 = vadd.f32 %v1471_v49, %v749_v35  ;;  %v804_v40 = vadd.f32 %v1471_v49, %v765_v36 }
 0x12d   : > { %v652_v41 = vpop.f32.mrf.mxu0  ;;  %v716_v42 = vpop.f32.mrf.mxu1 }
 0x12e   : > { %v820_v43 = vmax.f32 %v788_v39, 0.0  ;;  %v836_v44 = vmax.f32 %v804_v40, 0.0  ;;  %v750_v45 = vmul.f32 %v1466_v47, %v652_v41  ;;  %v766_v46 = vmul.f32 %v1466_v47, %v716_v42 }
 0x12f   : > { %v654_v48 = vpop.f32.mrf.mxu0  ;;  %v718_v50 = vpop.f32.mrf.mxu1 }
 0x130   : > { %852 = vst [vmem:[%s1481_s21 + $0x58] sm:$0xff] %v820_v43  ;;  %868 = vst [vmem:[%s1481_s21 + $0xd8] sm:$0xff] %v836_v44  ;;  %v789_v51 = vadd.f32 %v1471_v49, %v750_v45  ;;  %v805_v52 = vadd.f32 %v1471_v49, %v766_v46 }
 0x131   : > { %v655_v53 = vpop.f32.mrf.mxu0  ;;  %v719_v54 = vpop.f32.mrf.mxu1 }
 0x132   : > { %v821_v55 = vmax.f32 %v789_v51, 0.0  ;;  %v837_v56 = vmax.f32 %v805_v52, 0.0  ;;  %v751_v57 = vmul.f32 %v1466_v47, %v655_v53  ;;  %v767_v58 = vmul.f32 %v1466_v47, %v719_v54 }
 0x133   : > { %v657_v59 = vpop.f32.mrf.mxu0  ;;  %v721_v60 = vpop.f32.mrf.mxu1 }
 0x134   : > { %853 = vst [vmem:[%s1481_s21 + $0x60] sm:$0xff] %v821_v55  ;;  %869 = vst [vmem:[%s1481_s21 + $0xe0] sm:$0xff] %v837_v56  ;;  %v790_v61 = vadd.f32 %v1471_v49, %v751_v57  ;;  %v806_v62 = vadd.f32 %v1471_v49, %v767_v58 }
 0x135   : > { %v660_v63 = vpop.f32.mrf.mxu0  ;;  %v724_v0 = vpop.f32.mrf.mxu1 }
 0x136   : > { %v822_v1 = vmax.f32 %v790_v61, 0.0  ;;  %v838_v2 = vmax.f32 %v806_v62, 0.0  ;;  %v752_v3 = vmul.f32 %v1466_v47, %v660_v63  ;;  %v768_v4 = vmul.f32 %v1466_v47, %v724_v0 }
 0x137   : > { %v662_v5 = vpop.f32.mrf.mxu0  ;;  %v726_v6 = vpop.f32.mrf.mxu1 }
 0x138   : > { %854 = vst [vmem:[%s1481_s21 + $0x68] sm:$0xff] %v822_v1  ;;  %870 = vst [vmem:[%s1481_s21 + $0xe8] sm:$0xff] %v838_v2  ;;  %v791_v7 = vadd.f32 %v1471_v49, %v752_v3  ;;  %v807_v8 = vadd.f32 %v1471_v49, %v768_v4 }
 0x139   : > { %v663_v9 = vpop.f32.mrf.mxu0  ;;  %v727_v10 = vpop.f32.mrf.mxu1 }
 0x13a   : > { %v823_v11 = vmax.f32 %v791_v7, 0.0  ;;  %v839_v12 = vmax.f32 %v807_v8, 0.0  ;;  %v753_v13 = vmul.f32 %v1466_v47, %v663_v9  ;;  %v769_v14 = vmul.f32 %v1466_v47, %v727_v10 }
 0x13b   : > { %v665_v15 = vpop.f32.mrf.mxu0  ;;  %v729_v16 = vpop.f32.mrf.mxu1 }
 0x13c   : > { %855 = vst [vmem:[%s1481_s21 + $0x70] sm:$0xff] %v823_v11  ;;  %871 = vst [vmem:[%s1481_s21 + $0xf0] sm:$0xff] %v839_v12  ;;  %v792_v17 = vadd.f32 %v1471_v49, %v753_v13  ;;  %v808_v18 = vadd.f32 %v1471_v49, %v769_v14 }
 0x13e   : > { %v824_v47 = vmax.f32 %v792_v17, 0.0  ;;  %v840_v19 = vmax.f32 %v808_v18, 0.0 }
 0x140   : > { %856 = vst [vmem:[%s1481_s21 + $0x78] sm:$0xff] %v824_v47  ;;  %872 = vst [vmem:[%s1481_s21 + $0xf8] sm:$0xff] %v840_v19 }
 0x141   : > { %1228 = shalt.err (!%p1225_p5)
}
 0x142   : > { %s1229_s12 = scalar_lea.hbm %s1576_s7, 4096  ;;  %s1233_s22 = scalar_lea.hbm %s1633_s4, 8192 }
 0x143   : > { %p1230_p6 = scmp.ne.s32.totalorder %s1576_s7, %s1229_s12  ;;  %p1234_p10 = scmp.lt.s32.totalorder %s1576_s7, %s1633_s4 }
 0x144   : > { %p1235_p11 = scmp.lt.s32.totalorder %s1233_s22, %s1229_s12 }
 0x145   : > { %p1231_p7 = pnand %p1230_p6, %p1363_p4 }
 0x146   : > { %p1236_p12 = por %p1235_p11, %p1234_p10 }
 0x147   : > { %p1232_p9 = pneg %p1231_p7 }
 0x149   : > { %p1237_p13 = pnand %p1236_p12, %p1232_p9 }
 0x14b   : > { %1240 = shalt.err (!%p1237_p13)
}
 0x14c   : > { %s1296_s21 = smov 128   ;;  %s1297_s29 = smov 8  }
 0x14d   : > { %1098 = dma.vmem_to_hbm [thread:$0]  (%p1363_p4), %s1578_s30, 4096, %s1576_s7, %s1584_s18, %s1296_s21, %s1296_s21, %s1297_s29  }
 0x14e PF: > { %p1104_p0 = scmp.ge.s32.totalorder %s1291_s20, 2  ;;  %s903_s5 = sand.u32 1, %s1271_s15  }
 0x14f   : > { %s904_s6 = scalar_lea.sflag [#allocation3], %s903_s5 }
 0x150   : > { %p1101_p1 = pnand %p1104_p0, %p1370_p8 }
 0x152   : > { %p1102_p2 = pneg %p1101_p1 }
 0x154   : > { %1266 = dma.done.wait (%p1102_p2), %s904_s6, 4096  }
 0x155   : > { %1268 = vsyncadd (%p1102_p2), %s904_s6, 4294963200  ;;  %s17_s20 = sadd.s32 1, %s1291_s20   ;;  %s1636_s15 = smov %s1275_s16 }
 0x156   : > { %p14_p3 = scmp.ge.s32.totalorder %s17_s20, 4   ;;  %s1637_s16 = smov %s1279_s17 }
 0x157   : > { %s1638_s17 = smov %s1376_s28  ;;  %s1639_s18 = smov %s1287_s19 }
 0x158   : > { %s1640_s19 = smov %s1642_s23  ;;  %16 = sbr.rel (!%p14_p3) target bundleno = 4 (0x4), region = 80 }
 0x15d   :  { %909 = vsyncpa [#allocation3], 1 }
 0x15e   :  { %911 = vsyncpa [#allocation3 + $0x1], 1 }

</bundles_post_ra>
